<compile_context>
chip_gen: v5e
topology: v5e:2x2
jax: 0.10.0
libtpu: 0.0.40
codegen_flags: <defaults>
</compile_context>

<pallas_src>
import functools

import jax
import jax.numpy as jnp
from jax.experimental import pallas as pl
from jax.experimental.pallas import tpu as pltpu

_LANES = 128


def _vmem_capacity_bytes():
    try:
        return int(pltpu.get_tpu_info().vmem_capacity_bytes)
    except Exception:
        return 64 << 20  # conservative (v7x per-TC VMEM); safe on all chips


def _chip_has_bf16_math():
    """bf16 VPU/EUP exists on v6e/v7x; v5e and older are f32-only."""
    try:
        kind = jax.devices()[0].device_kind.lower()
    except Exception:
        return False
    return ("v6" in kind) or ("v7" in kind)


def _largest_divisor_leq(n, cap):
    for d in range(max(1, min(n, cap)), 0, -1):
        if n % d == 0:
            return d
    return 1


def _pixel_sum_kernel(x_ref, t_ref, out_ref, *, compute_dtype):
    # x_ref, t_ref: (nb, C, rt, 128) tiles in the NATIVE input dtype.
    # out_ref:      (nb, 1) f32 partial sum of softmax(x)*t over this tile.
    x = x_ref[...].astype(compute_dtype)               # cast in VMEM (VPU)
    t = t_ref[...].astype(compute_dtype)
    # Stable softmax over channels (axis 1).  With the 4-D layout the last two
    # dims are fully dense, so these are C-1 elementwise max/add ops.
    m = jnp.max(x, axis=1, keepdims=True)               # (nb, 1, rt, 128)
    e = jnp.exp(x - m)                                  # (nb, C, rt, 128), EUP
    # Accumulate channel sums in f32 regardless of the compute dtype.
    num = jnp.sum((e * t).astype(jnp.float32), axis=1)  # (nb, rt, 128)
    den = jnp.sum(e.astype(jnp.float32), axis=1)        # (nb, rt, 128)
    # EUP reciprocal + one Newton step on the VALU -> ~f32 accuracy, 1/pixel.
    inv = pl.reciprocal(den, approx=True)
    inv = inv * (2.0 - den * inv)
    out_ref[...] = jnp.sum(num * inv, axis=(1, 2))[:, None]   # (nb, 1)


def pixel_loss(inputs, targets):
    """inputs, targets: (N, C, H, W), any float dtype. Returns scalar f32."""
    assert inputs.shape == targets.shape
    N, C, H, W = inputs.shape
    HW = H * W
    itemsize = jnp.dtype(inputs.dtype).itemsize

    compute_dtype = (
        jnp.bfloat16
        if (inputs.dtype == jnp.bfloat16 and _chip_has_bf16_math())
        else jnp.float32
    )

    # ---- generation-aware per-tile element budget ---------------------------
    # Per tile element: 2 inputs x 2 pipeline buffers (native dtype) plus
    # roughly 6 f32-sized intermediates inside the kernel.  Target ~1/4 of the
    # chip's VMEM so double-buffering + intermediates always fit.
    vmem_cap = _vmem_capacity_bytes()
    bytes_per_elem = 4 * itemsize + 6 * 4
    elem_budget = max(64 * 1024, (vmem_cap // 4) // bytes_per_elem)

    x = inputs.reshape(N, C, HW)
    t = targets.reshape(N, C, HW)

    # ---- spatial re-layout: (N, C, rows, 128), lane-dense last dim ----------
    sub = 8 if itemsize >= 4 else 16          # sublane granularity (f32 / bf16)
    r0 = -(-HW // _LANES)                     # rows of 128 lanes (ceil)
    cap_rows = max(1, elem_budget // (C * _LANES))
    if r0 <= cap_rows:
        rt, rp = r0, r0                       # full-dim block (exempt from %8)
    else:
        cap_s = max(sub, (cap_rows // sub) * sub)
        rt = None
        if r0 % sub == 0:
            # Prefer a large aligned divisor near the cap -> no padding copy.
            for cand in range(cap_s, max(sub, cap_s // 2) - 1, -sub):
                if r0 % cand == 0:
                    rt, rp = cand, r0
                    break
        if rt is None:
            rt = cap_s
            rp = -(-r0 // rt) * rt            # pad rows; zero targets -> exact
    hwp = rp * _LANES
    if hwp != HW:
        pad = hwp - HW
        x = jnp.pad(x, ((0, 0), (0, 0), (0, pad)))
        t = jnp.pad(t, ((0, 0), (0, 0), (0, pad)))
    x = x.reshape(N, C, rp, _LANES)
    t = t.reshape(N, C, rp, _LANES)

    # ---- batch tiling --------------------------------------------------------
    nb = _largest_divisor_leq(N, max(1, elem_budget // (C * rt * _LANES)))
    g_n, g_s = N // nb, rp // rt
    if g_n * g_s == 1 and N > 1:
        # Keep at least 2 grid steps so v7x's second TensorCore gets work.
        nb = _largest_divisor_leq(N, max(1, N // 2))
        g_n = N // nb

    # ---- explicit VMEM limit sized from the actual tile ---------------------
    tile_elems = nb * C * rt * _LANES
    vmem_need = 4 * tile_elems * itemsize + 6 * tile_elems * 4 + (2 << 20)
    vmem_limit = int(min(vmem_cap, max(vmem_need, 32 << 20)))

    kernel = functools.partial(_pixel_sum_kernel, compute_dtype=compute_dtype)
    partial_sums = pl.pallas_call(
        kernel,
        out_shape=jax.ShapeDtypeStruct((g_n, g_s, nb, 1), jnp.float32),
        grid=(g_n, g_s),
        in_specs=[
            pl.BlockSpec((nb, C, rt, _LANES), lambda n, s: (n, 0, s, 0)),
            pl.BlockSpec((nb, C, rt, _LANES), lambda n, s: (n, 0, s, 0)),
        ],
        out_specs=pl.BlockSpec(
            (pl.Squeezed(), pl.Squeezed(), nb, 1), lambda n, s: (n, s, 0, 0)
        ),
        compiler_params=pltpu.CompilerParams(
            dimension_semantics=("parallel", "parallel"),
            vmem_limit_bytes=vmem_limit,
        ),
    )(x, t)

    # Tiny glue: finish the spatial-tile reduction, then the batch mean.
    sums = jnp.sum(partial_sums[..., 0], axis=1).reshape(N)   # (N,)
    return jnp.mean(1.0 - sums / HW)                          # TRUE H*W


def _reference(inputs, targets):
    p = jax.nn.softmax(inputs.astype(jnp.float32), axis=1)
    s = jnp.sum(p * targets.astype(jnp.float32), axis=(1, 2, 3))
    return jnp.mean(1.0 - s / (inputs.shape[2] * inputs.shape[3]))


if __name__ == "__main__":
    key = jax.random.PRNGKey(0)
    k1, k2 = jax.random.split(key)

    N, C, H, W = 2, 4, 16, 16
    inputs = jax.random.normal(k1, (N, C, H, W), dtype=jnp.float32)
    # Segmentation-style one-hot targets over the channel axis.
    labels = jax.random.randint(k2, (N, H, W), 0, C)
    targets = jnp.transpose(
        jax.nn.one_hot(labels, C, dtype=jnp.float32), (0, 3, 1, 2)
    )

    loss = jax.block_until_ready(pixel_loss(inputs, targets))
    ref = jax.block_until_ready(_reference(inputs, targets))
    assert jnp.allclose(loss, ref, atol=1e-4, rtol=1e-4), (loss, ref)

    # Native-bf16 path: no wrapper cast; bf16 exp on v6e/v7x, f32 on v5e.
    x_bf16 = inputs.astype(jnp.bfloat16)
    t_bf16 = targets.astype(jnp.bfloat16)
    loss_bf16 = jax.block_until_ready(pixel_loss(x_bf16, t_bf16))
    ref_bf16 = jax.block_until_ready(_reference(x_bf16, t_bf16))
    assert jnp.allclose(loss_bf16, ref_bf16, atol=5e-3, rtol=5e-3), (
        loss_bf16,
        ref_bf16,
    )

    # Non-multiple-of-128 spatial shape exercises the zero-padding path.
    Hp, Wp = 10, 13
    x_odd = jax.random.normal(k1, (N, C, Hp, Wp), dtype=jnp.float32)
    lbl_odd = jax.random.randint(k2, (N, Hp, Wp), 0, C)
    t_odd = jnp.transpose(jax.nn.one_hot(lbl_odd, C, dtype=jnp.float32),
                          (0, 3, 1, 2))
    loss_odd = jax.block_until_ready(pixel_loss(x_odd, t_odd))
    ref_odd = jax.block_until_ready(_reference(x_odd, t_odd))
    assert jnp.allclose(loss_odd, ref_odd, atol=1e-4, rtol=1e-4), (
        loss_odd, ref_odd,
    )

    print("KERNEL_OK")
</pallas_src>

<mosaic_0001>
module attributes {stable_mosaic.version = 11 : i64} {
  func.func @_pixel_sum_kernel(%arg0: i32, %arg1: i32, %arg2: memref<1x4x2x128xf32, #tpu.memory_space<vmem>>, %arg3: memref<1x4x2x128xf32, #tpu.memory_space<vmem>>, %arg4: memref<1x1x1x1xf32, #tpu.memory_space<vmem>>) attributes {dimension_semantics = [#tpu.dimension_semantics<parallel>, #tpu.dimension_semantics<parallel>], iteration_bounds = array<i64: 2, 1>, scalar_prefetch = 0 : i64, scratch_operands = 0 : i64, tpu.core_type = #tpu.core_type<tc>, window_params = [{transform_indices = @transform_0, window_bounds = array<i64: 1, 4, 2, 128>}, {transform_indices = @transform_1, window_bounds = array<i64: 1, 4, 2, 128>}, {transform_indices = @transform_2, window_bounds = array<i64: 1, 1, 1, 1>}]} {
    %c0 = arith.constant 0 : index
    %c0_0 = arith.constant 0 : index
    %c0_1 = arith.constant 0 : index
    %c0_2 = arith.constant 0 : index
    %0 = vector.load %arg2[%c0, %c0_0, %c0_1, %c0_2] : memref<1x4x2x128xf32, #tpu.memory_space<vmem>>, vector<1x4x2x128xf32>
    %c0_3 = arith.constant 0 : index
    %c0_4 = arith.constant 0 : index
    %c0_5 = arith.constant 0 : index
    %c0_6 = arith.constant 0 : index
    %1 = vector.load %arg3[%c0_3, %c0_4, %c0_5, %c0_6] : memref<1x4x2x128xf32, #tpu.memory_space<vmem>>, vector<1x4x2x128xf32>
    %cst = arith.constant dense<0xFF800000> : vector<1x2x128xf32>
    %2 = vector.multi_reduction <maximumf>, %0, %cst [1] : vector<1x4x2x128xf32> to vector<1x2x128xf32>
    %3 = vector.shape_cast %2 : vector<1x2x128xf32> to vector<1x1x2x128xf32>
    %4 = vector.broadcast %3 : vector<1x1x2x128xf32> to vector<1x4x2x128xf32>
    %5 = arith.subf %0, %4 : vector<1x4x2x128xf32>
    %6 = math.exp %5 : vector<1x4x2x128xf32>
    %7 = arith.mulf %6, %1 : vector<1x4x2x128xf32>
    %cst_7 = arith.constant dense<0.000000e+00> : vector<1x2x128xf32>
    %8 = vector.multi_reduction <add>, %7, %cst_7 [1] : vector<1x4x2x128xf32> to vector<1x2x128xf32>
    %cst_8 = arith.constant dense<0.000000e+00> : vector<1x2x128xf32>
    %9 = vector.multi_reduction <add>, %6, %cst_8 [1] : vector<1x4x2x128xf32> to vector<1x2x128xf32>
    %10 = tpu.reciprocal %9 {approx = true} : vector<1x2x128xf32> -> vector<1x2x128xf32>
    %11 = arith.mulf %9, %10 : vector<1x2x128xf32>
    %cst_9 = arith.constant 2.000000e+00 : f32
    %12 = vector.broadcast %cst_9 : f32 to vector<1x2x128xf32>
    %13 = arith.subf %12, %11 : vector<1x2x128xf32>
    %14 = arith.mulf %10, %13 : vector<1x2x128xf32>
    %15 = arith.mulf %8, %14 : vector<1x2x128xf32>
    %cst_10 = arith.constant dense<0.000000e+00> : vector<1xf32>
    %16 = vector.multi_reduction <add>, %15, %cst_10 [1, 2] : vector<1x2x128xf32> to vector<1xf32>
    %17 = vector.shape_cast %16 : vector<1xf32> to vector<1x1xf32>
    %c0_11 = arith.constant 0 : index
    %c0_12 = arith.constant 0 : index
    %c0_13 = arith.constant 0 : index
    %c0_14 = arith.constant 0 : index
    %18 = vector.load %arg4[%c0_11, %c0_12, %c0_13, %c0_14] : memref<1x1x1x1xf32, #tpu.memory_space<vmem>>, vector<1x1x1x1xf32>
    %19 = vector.shape_cast %18 : vector<1x1x1x1xf32> to vector<1x1xf32>
    %20 = vector.shape_cast %17 : vector<1x1xf32> to vector<1x1x1x1xf32>
    tpu.vector_store %arg4[%c0_11, %c0_12, %c0_13, %c0_14], %20 {strides = array<i32>} : memref<1x1x1x1xf32, #tpu.memory_space<vmem>>, vector<1x1x1x1xf32>,
    return
  }
  func.func @transform_0(%arg0: i32, %arg1: i32) -> (i32, i32, i32, i32) {
    %c0_i32 = arith.constant 0 : i32
    %c0_i32_0 = arith.constant 0 : i32
    %c0_i32_1 = arith.constant 0 : i32
    return %arg0, %c0_i32, %arg1, %c0_i32_0 : i32, i32, i32, i32
  }
  func.func @transform_1(%arg0: i32, %arg1: i32) -> (i32, i32, i32, i32) {
    %c0_i32 = arith.constant 0 : i32
    %c0_i32_0 = arith.constant 0 : i32
    %c0_i32_1 = arith.constant 0 : i32
    return %arg0, %c0_i32, %arg1, %c0_i32_0 : i32, i32, i32, i32
  }
  func.func @transform_2(%arg0: i32, %arg1: i32) -> (i32, i32, i32, i32) {
    %c0_i32 = arith.constant 0 : i32
    %c0_i32_0 = arith.constant 0 : i32
    %c0_i32_1 = arith.constant 0 : i32
    return %arg0, %arg1, %c0_i32, %c0_i32_0 : i32, i32, i32, i32
  }
}

</mosaic_0001>

<bundles_post_ra>
// kernel: tpu_custom_call.1
= control target key start
LH: loop header
LB: loop body
LE: loop exit
PB: predicated region body
PF: predicated region fallthrough
CT: control target
= control target key end

     0   :  { %7 = vsyncpa [#allocation3], 0  ;;  %s745_s0 = inlined_call_operand.hbm [shape: f32[2,4,2,128], index: 0, kind: input, shape index: {}]   ;;  %s746_s1 = inlined_call_operand.hbm [shape: f32[2,4,2,128], index: 1, kind: input, shape index: {}]   ;;  %s747_s2 = inlined_call_operand.vmem [shape: f32[2,1,1,1], index: 2, kind: output, shape index: {}]  }
   0x1   :  { %9 = vsyncpa [#allocation3 + $0x1], 0 }
   0x2   :  { %10 = vsyncpa [#allocation5], 0 }
   0x3   :  { %12 = vsyncpa [#allocation5 + $0x1], 0  ;;  %s618_s9 = smov 0   ;;  %s620_s10 = smov 0  }
   0x4   :  { %s622_s11 = smov 0   ;;  %s624_s12 = smov 0  }
   0x5   :  { %s626_s13 = smov 0   ;;  %s628_s14 = smov 0  }
   0x6 LB: > { %s396_s15 = sadd.s32 4294967295, %s599_s14   ;;  %s30_s16 = sadd.s32 1, %s595_s13  ;;  %s599_s14 = sphi %s628_s14, %s18_s14   ;;  %s595_s13 = sphi %s626_s13, %s755_s13   ;;  %s591_s12 = sphi %s624_s12, %s754_s12   ;;  %s587_s11 = sphi %s622_s11, %s753_s11   ;;  %s583_s10 = sphi %s620_s10, %s752_s10   ;;  %s579_s9 = sphi %s618_s9, %s751_s9  }
   0x7   : > { %p32_p0 = scmp.ge.s32.totalorder %s30_s16, 2  ;;  %s39_s17 = sadd.s32 1, %s587_s11 }
   0x8   : > { %p46_p1 = scmp.ne.s32.totalorder %s587_s11, %s583_s10  ;;  %p47_p2 = scmp.eq.s32.totalorder %s599_s14, 0 }
   0x9   : > { %s757_s16 = smov (%p32_p0, %s30_s16), 0  ;;  %p52_p4 = scmp.ne.s32.totalorder %s583_s10, %s579_s9 }
   0xa   : > { %p654_p3 = por %p47_p2, %p46_p1  ;;  %s34_s19 = ssub.s32 %s595_s13, %s757_s16 }
   0xb   : > { %p53_p5 = scmp.eq.s32.totalorder %s396_s15, 0  ;;  %p37_p6 = scmp.eq.s32.totalorder %s34_s19, 0 }
   0xc   : > { %p424_p8 = scmp.lt.s32.totalorder %s599_s14, 2  ;;  %s670_s22 = sand.u32 1, %s587_s11  }
   0xd   : > { %p661_p7 = por %p53_p5, %p52_p4  ;;  %s411_s23 = sshll.u32 %s595_s13, 3 }
   0xe   : > { %s667_s21 = scalar_select %p37_p6, %s587_s11, %s39_s17  }
   0xf   : > { %s400_s24 = sshll.u32 %s670_s22, 3  ;;  %s142_s27 = scalar_lea.hbm %s745_s0, %s411_s23 }
  0x10   : > { %s143_s28 = sshll.u32 %s142_s27, 4  ;;  %s136_s29 = scalar_lea.vmem [#allocation2], %s400_s24  ;;  %s144_s28 = int_to_ptr.hbm [resolvable:$true] %s143_s28 }
  0x11   : > { %s145_s30 = sshll.u32 %s136_s29, 4  ;;  %p679_p9 = pnand %p424_p8, %p654_p3  ;;  %s146_s30 = int_to_ptr.vmem [resolvable:$true] %s145_s30 }
  0x12   : > { %p406_p10 = scmp.ge.s32.totalorder %s599_s14, 1  ;;  %p176_p11 = scmp.lt.s32.totalorder %s599_s14, 3 }
  0x13   : > { %s133_s4 = scalar_lea.sflag [#allocation3], %s670_s22  ;;  %s601_s5 = smov 32  }
  0x14   : > { %s602_s6 = smov 2   ;;  %p177_p12 = pnand %p406_p10, %p176_p11 }
  0x15   : > { %420 = dma.hbm_to_vmem [thread:$0]  (!%p679_p9), %s144_s28, 128, %s146_s30, %s133_s4, %s601_s5, %s601_s5, %s602_s6  }
  0x16   : > { %s165_s9 = scalar_lea.hbm %s746_s1, %s411_s23  ;;  %s159_s17 = scalar_lea.vmem [#allocation4], %s400_s24 }
  0x17   : > { %s166_s15 = sshll.u32 %s165_s9, 4  ;;  %s168_s18 = sshll.u32 %s159_s17, 4  ;;  %s167_s15 = int_to_ptr.hbm [resolvable:$true] %s166_s15  ;;  %s169_s18 = int_to_ptr.vmem [resolvable:$true] %s168_s18 }
  0x18   : > { %s156_s19 = scalar_lea.sflag [#allocation5], %s670_s22  ;;  %180 = sbr.rel (%p177_p12) target bundleno = 203 (0xcb), region = 28 }
  0x19   : > { %423 = dma.hbm_to_vmem [thread:$0]  (!%p679_p9), %s167_s15, 128, %s169_s18, %s156_s19, %s601_s5, %s601_s5, %s602_s6  }
  0x1a   : > { %s182_s25 = sand.u32 (!%p177_p12), 1, %s583_s10  }
  0x1b   : > { %s407_s26 = sshll.u32 (!%p177_p12), %s182_s25, 3  ;;  %s183_s27 = scalar_lea.sflag (!%p177_p12), [#allocation3], %s182_s25 }
  0x1c   : > { %s186_s28 = scalar_lea.vmem (!%p177_p12), [#allocation2], %s407_s26 }
  0x1d   : > { %570 = dma.done.wait (%p661_p7), %s183_s27, 128  }
  0x1e   : > { %572 = vsyncadd (%p661_p7), %s183_s27, 4294967168  ;;  %s193_s23 = scalar_lea.sflag [#allocation5], %s182_s25  ;;  %s699_s24 = scalar_lea.vmem [#allocation4], %s407_s26 }
  0x1f   : > { %574 = dma.done.wait (%p661_p7), %s193_s23, 128  }
  0x20   : > { %576 = vsyncadd (%p661_p7), %s193_s23, 4294967168  ;;  %vm238_vm0 = vcmask 1041408   ;;  %v230_v0 = vld [vmem:[%s186_s28] sm:$0x3]  ;;  %v231_v1 = vld [vmem:[%s186_s28 + $0x2] sm:$0x3] }
  0x21   : > { %v232_v2 = vld [vmem:[%s186_s28 + $0x4] sm:$0x3]  ;;  %v233_v3 = vld [vmem:[%s186_s28 + $0x6] sm:$0x3]  ;;  %v239_v4 = vsel %vm238_vm0, %v230_v0, -inf  ;;  %v240_v5 = vsel %vm238_vm0, %v231_v1, -inf }
  0x22   : > { %v241_v6 = vsel %vm238_vm0, %v232_v2, -inf  ;;  %v242_v7 = vsel %vm238_vm0, %v233_v3, -inf  ;;  %v243_v8 = vmax.f32 %v239_v4, %v240_v5  ;;  %v234_v20 = vld [vmem:[%s699_s24] sm:$0x3]  ;;  %v235_v21 = vld [vmem:[%s699_s24 + $0x2] sm:$0x3] }
  0x23   : > { %v244_v9 = vmax.f32 %v241_v6, %v242_v7  ;;  %v236_v31 = vld [vmem:[%s699_s24 + $0x4] sm:$0x3]  ;;  %v237_v38 = vld [vmem:[%s699_s24 + $0x6] sm:$0x3]  ;;  %p224_p13 = scmp.lt.s32.totalorder %s591_s12, 1  ;;  %vm290_vm1 = vcmask 0  }
  0x25   : > { %v245_v10 = vmax.f32 %v243_v8, %v244_v9  ;;  %s759_s12 = smov (!%p224_p13, %s591_s12), 1 }
  0x26   : > { %s229_s29 = scalar_lea.vmem %s747_s2, %s759_s12 }
  0x27   : > { %v246_v11 = vsub.f32 %v230_v0, %v245_v10  ;;  %v247_v12 = vsub.f32 %v231_v1, %v245_v10  ;;  %v248_v13 = vsub.f32 %v232_v2, %v245_v10  ;;  %v249_v14 = vsub.f32 %v233_v3, %v245_v10 }
  0x29   : > { %v250_v15 = vmul.f32 1.442695, %v246_v11  ;;  %v252_v16 = vmul.f32 1.442695, %v247_v12  ;;  %v254_v17 = vmul.f32 1.442695, %v248_v13 }
  0x2a   : > { %v256_v18 = vmul.f32 1.442695, %v249_v14 }
  0x2b   : > { %475 = vpow2.f32 %v250_v15 }
  0x2c   : > { %477 = vpow2.f32 %v252_v16 }
  0x2d   : > { %479 = vpow2.f32 %v254_v17 }
  0x2e   : > { %481 = vpow2.f32 %v256_v18 }
  0x31   : > { %v476_v19 = vpop.eup %475 }
  0x32   : > { %v478_v22 = vpop.eup %477  ;;  %v269_v23 = vsel %vm238_vm0, %v476_v19, 0.0  ;;  %v258_v27 = vmul.f32 %v476_v19, %v234_v20 }
  0x33   : > { %v480_v24 = vpop.eup %479  ;;  %v270_v25 = vsel %vm238_vm0, %v478_v22, 0.0  ;;  %v259_v28 = vmul.f32 %v478_v22, %v235_v21 }
  0x34   : > { %v482_v26 = vpop.eup %481  ;;  %v271_v29 = vadd.f32 %v270_v25, %v269_v23  ;;  %v272_v30 = vsel %vm238_vm0, %v480_v24, 0.0  ;;  %v260_v34 = vmul.f32 %v480_v24, %v236_v31  ;;  %v262_v35 = vsel %vm238_vm0, %v258_v27, 0.0 }
  0x35   : > { %v274_v32 = vsel %vm238_vm0, %v482_v26, 0.0  ;;  %v263_v36 = vsel %vm238_vm0, %v259_v28, 0.0  ;;  %v261_v40 = vmul.f32 %v482_v26, %v237_v38 }
  0x36   : > { %v273_v33 = vadd.f32 %v272_v30, %v271_v29  ;;  %v264_v39 = vadd.f32 %v263_v36, %v262_v35  ;;  %v265_v41 = vsel %vm238_vm0, %v260_v34, 0.0 }
  0x37   : > { %v267_v44 = vsel %vm238_vm0, %v261_v40, 0.0 }
  0x38   : > { %v275_v37 = vadd.f32 %v274_v32, %v273_v33  ;;  %v266_v42 = vadd.f32 %v265_v41, %v264_v39 }
  0x3a   : > { %483 = vrcp.f32 %v275_v37  ;;  %v268_v46 = vadd.f32 %v267_v44, %v266_v42 }
  0x40   : > { %v484_v43 = vpop.eup %483 }
  0x41   : > { %v277_v45 = vmul.f32 %v484_v43, %v275_v37 }
  0x43   : > { %v278_v47 = vsub.f32 2.0, %v277_v45 }
  0x45   : > { %v279_v48 = vmul.f32 %v484_v43, %v278_v47 }
  0x47   : > { %v280_v49 = vmul.f32 %v279_v48, %v268_v46 }
  0x49   : > { %v281_v50 = vsel %vm238_vm0, %v280_v49, 0.0 }
  0x4a   : > { %282 = vadd.xlane.f32.xlu0 %v281_v50 }
  0xbd   : > { %v283_v51 = vpop.xlane.xlu0 %282 }
  0xbe   : > { %v284_v52 = vrot.slane %v283_v51, 4 }
  0xc0   : > { %v285_v53 = vadd.f32 %v284_v52, %v283_v51 }
  0xc2   : > { %v286_v54 = vrot.slane %v285_v53, 2 }
  0xc4   : > { %v287_v55 = vadd.f32 %v286_v54, %v285_v53 }
  0xc6   : > { %v288_v56 = vrot.slane %v287_v55, 1 }
  0xc8   : > { %v289_v57 = vadd.f32 %v288_v56, %v287_v55 }
  0xca   : > { %291 = vst.msk [vmem:[%s229_s29] sm:$0x1] %vm290_vm1, %v289_v57 }
  0xcb PF: > { %s18_s14 = sadd.s32 1, %s599_s14   ;;  %s751_s9 = smov %s583_s10 }
  0xcc   : > { %p15_p0 = scmp.ge.s32.totalorder %s18_s14, 4   ;;  %s752_s10 = smov %s587_s11 }
  0xcd   : > { %s753_s11 = smov %s667_s21  ;;  %s754_s12 = smov %s595_s13 }
  0xce   : > { %s755_s13 = smov %s757_s16  ;;  %17 = sbr.rel (!%p15_p0) target bundleno = 6 (0x6), region = 81 }
  0xd3   :  { %315 = vsyncpa [#allocation3], 1 }
  0xd4   :  { %317 = vsyncpa [#allocation3 + $0x1], 1 }
  0xd5   :  { %318 = vsyncpa [#allocation5], 1 }
  0xd6   :  { %320 = vsyncpa [#allocation5 + $0x1], 1 }

</bundles_post_ra>
